<compile_context>
chip_gen: v5e
topology: v5e:2x2
jax: 0.10.0
libtpu: 0.0.40
codegen_flags: <defaults>
</compile_context>

<pallas_src>
import math

import jax
import jax.numpy as jnp
import numpy as np
from jax.experimental import pallas as pl
from jax.experimental.pallas import tpu as pltpu


def _round_up(x, m):
    return ((x + m - 1) // m) * m


def _geovec_mlp_kernel(x_ref, w1_ref, b1_ref, w2_ref, b2_ref, agg_ref, o_ref):
    # x_ref / o_ref: (tm, V*3) in the caller's dtype (natural memory layout of (..., V, 3)).
    # w1_ref: (V*3, Vm*3)   w2_ref: (Vm*3, V*3)   agg_ref: (Vm*3, Vm*3)   b*: (1, F) -- all f32,
    # tiny, VMEM-resident across the row grid.
    x = x_ref[...].astype(jnp.float32)

    # GeoVecLinear1 + bias:  h[n, 3j+c] = sum_i x[n, 3i+c] * W1[j, i] + b1[j, c]
    h = jnp.dot(x, w1_ref[...], preferred_element_type=jnp.float32) + b1_ref[...]

    # Gate = sigmoid(||h_j||_2) exactly like _norm_no_nan: sum of the 3 component squares
    # (reduced + broadcast back across the xyz triplet by the 0/1 aggregation matrix on the
    # MXU, which has plenty of slack), clamped at 1e-8, sqrt, sigmoid.  Divide goes to the EUP.
    nsq = jnp.dot(h * h, agg_ref[...], preferred_element_type=jnp.float32)
    r = jnp.sqrt(jnp.maximum(nsq, 1e-8))
    gate = pl.reciprocal(1.0 + jnp.exp(-r), approx=True)

    # GeoVecLinear2 + bias + residual (re-read the input tile instead of holding it live).
    y = jnp.dot(h * gate, w2_ref[...], preferred_element_type=jnp.float32) + b2_ref[...]
    y = y + x_ref[...].astype(jnp.float32)
    o_ref[...] = y.astype(o_ref.dtype)


def _geovec_mlp_gvp_forward_impl(vec, w1, b1, w2, b2):
    """Eval-mode forward of GeoVecMLP_gvp.

    vec: (..., V, 3); w1: (Vm, V); b1: (Vm, 3); w2: (V, Vm); b2: (V, 3).
    """
    orig_dtype = vec.dtype
    lead = vec.shape[:-2]
    V = vec.shape[-2]
    assert vec.shape[-1] == 3
    Vm = w1.shape[0]
    N = math.prod(lead) if lead else 1
    F_in, F_mid = V * 3, Vm * 3

    # Expanded weights acting on the flattened (V*3) feature axis (tiny, built once per call):
    #   W_exp[3i+c', 3j+c] = W[j, i] * delta(c, c')          (GeoVecLinear on the vector index)
    #   Agg[3i+c', 3j+c]   = delta(i, j)                     (norm^2 reduce+broadcast over xyz)
    eye3 = jnp.eye(3, dtype=jnp.float32)
    w1e = jnp.kron(jnp.transpose(w1).astype(jnp.float32), eye3)                       # (F_in, F_mid)
    w2e = jnp.kron(jnp.transpose(w2).astype(jnp.float32), eye3)                       # (F_mid, F_in)
    agg = jnp.kron(jnp.eye(Vm, dtype=jnp.float32), jnp.ones((3, 3), jnp.float32))     # (F_mid, F_mid)
    b1f = b1.reshape(1, F_mid).astype(jnp.float32)
    b2f = b2.reshape(1, F_in).astype(jnp.float32)

    # Free reshape -- the kernel consumes the natural row-major layout, original dtype.
    x2d = vec.reshape(N, F_in)

    # Large row tile to amortize per-step overhead, capped so the "parallel" grid keeps >= 2
    # steps (v7x megacore) whenever N allows; pl.cdiv grid -> no padding rows are DMA'd.
    tm = max(8, min(4096, _round_up((N + 1) // 2, 8)))
    grid = (pl.cdiv(N, tm),)

    out = pl.pallas_call(
        _geovec_mlp_kernel,
        out_shape=jax.ShapeDtypeStruct((N, F_in), orig_dtype),
        grid_spec=pltpu.PrefetchScalarGridSpec(
            num_scalar_prefetch=0,
            grid=grid,
            in_specs=[
                pl.BlockSpec((tm, F_in), lambda i: (i, 0)),        # x rows (streamed)
                pl.BlockSpec((F_in, F_mid), lambda i: (0, 0)),     # W1_exp (resident)
                pl.BlockSpec((1, F_mid), lambda i: (0, 0)),        # b1
                pl.BlockSpec((F_mid, F_in), lambda i: (0, 0)),     # W2_exp (resident)
                pl.BlockSpec((1, F_in), lambda i: (0, 0)),         # b2
                pl.BlockSpec((F_mid, F_mid), lambda i: (0, 0)),    # Agg (resident)
            ],
            out_specs=pl.BlockSpec((tm, F_in), lambda i: (i, 0)),
        ),
        compiler_params=pltpu.CompilerParams(
            dimension_semantics=("parallel",),
        ),
    )(x2d, w1e, b1f, w2e, b2f, agg)

    return out.reshape(*lead, V, 3)


geovec_mlp_gvp_forward = jax.jit(_geovec_mlp_gvp_forward_impl)


class GeoVecMLPgvpPallas:
    """JAX/Pallas equivalent of GeoVecMLP_gvp(num_vec_in, n, dropout), eval-mode forward."""

    def __init__(self, num_vec_in, n=2, dropout=0.1, key=None):
        self.num_vec_in = num_vec_in
        self.n = n
        self.dropout = dropout
        if key is None:
            key = jax.random.PRNGKey(0)
        v_in, v_mid = num_vec_in, num_vec_in * n
        # Linear1.Linear: glorot uniform (xavier_uniform, gain=1) on a (v_mid, v_in) weight.
        a = (6.0 / (v_in + v_mid)) ** 0.5
        self.w1 = jax.random.uniform(key, (v_mid, v_in), jnp.float32, minval=-a, maxval=a)
        self.b1 = jnp.zeros((v_mid, 3), jnp.float32)     # GeoVecLinear bias parameter
        # Linear2.Linear is explicitly zero-initialised by GeoVecMLP_gvp (_zero_init(False)).
        self.w2 = jnp.zeros((v_in, v_mid), jnp.float32)
        self.b2 = jnp.zeros((v_in, 3), jnp.float32)

    def __call__(self, vec):
        # TODO(synk): training-mode row dropout (torch.rand mask + rescale) is not implemented;
        # this is the eval-mode forward pass.
        return geovec_mlp_gvp_forward(vec, self.w1, self.b1, self.w2, self.b2)


if __name__ == "__main__":
    key = jax.random.PRNGKey(0)
    k_x, k_w1, k_w2, k_b1, k_b2 = jax.random.split(key, 5)

    B, L, num_vec_in, n = 2, 8, 8, 2
    vec = jax.random.normal(k_x, (B, L, num_vec_in, 3), jnp.float32)

    module = GeoVecMLPgvpPallas(num_vec_in, n=n, key=k_w1)

    # 1) Faithful default init: Linear2 weight/bias are zero, so the eval forward must
    #    return the input (pure residual path).
    out0 = jax.block_until_ready(module(vec))
    assert out0.shape == vec.shape
    assert np.allclose(np.asarray(out0), np.asarray(vec), atol=1e-5, rtol=1e-5)

    # 2) Randomise all parameters to exercise the full datapath; check against a float64
    #    numpy reference of the PyTorch eval-mode forward.
    module.w2 = 0.5 * jax.random.normal(k_w2, (num_vec_in, num_vec_in * n), jnp.float32)
    module.b1 = 0.5 * jax.random.normal(k_b1, (num_vec_in * n, 3), jnp.float32)
    module.b2 = 0.5 * jax.random.normal(k_b2, (num_vec_in, 3), jnp.float32)
    out = jax.block_until_ready(module(vec))

    def ref_forward(vec_, w1_, b1_, w2_, b2_):
        v = np.asarray(vec_, np.float64)
        w1_ = np.asarray(w1_, np.float64)
        b1_ = np.asarray(b1_, np.float64)
        w2_ = np.asarray(w2_, np.float64)
        b2_ = np.asarray(b2_, np.float64)
        h = np.einsum('blic,ji->bljc', v, w1_) + b1_
        nrm = np.sqrt(np.maximum(np.sum(h * h, axis=-1, keepdims=True), 1e-8))
        h = h * (1.0 / (1.0 + np.exp(-nrm)))
        y = np.einsum('blic,ji->bljc', h, w2_) + b2_
        return y + v

    ref = ref_forward(vec, module.w1, module.b1, module.w2, module.b2)
    # Tolerance covers the MXU evaluating f32 matmuls via bf16 passes and the approx EUP
    # reciprocal in the gate; any structural bug would produce O(0.1..1) errors.
    err = float(np.max(np.abs(np.asarray(out, np.float64) - ref)))
    assert np.allclose(np.asarray(out, np.float64), ref, atol=2e-2, rtol=2e-2), err

    print("KERNEL_OK")
</pallas_src>

<mosaic_0001>
module attributes {stable_mosaic.version = 11 : i64} {
  func.func @_geovec_mlp_kernel(%arg0: i32, %arg1: memref<8x24xf32, #tpu.memory_space<vmem>>, %arg2: memref<24x48xf32, #tpu.memory_space<vmem>>, %arg3: memref<1x48xf32, #tpu.memory_space<vmem>>, %arg4: memref<48x24xf32, #tpu.memory_space<vmem>>, %arg5: memref<1x24xf32, #tpu.memory_space<vmem>>, %arg6: memref<48x48xf32, #tpu.memory_space<vmem>>, %arg7: memref<8x24xf32, #tpu.memory_space<vmem>>) attributes {dimension_semantics = [#tpu.dimension_semantics<parallel>], iteration_bounds = array<i64: 2>, scalar_prefetch = 0 : i64, scratch_operands = 0 : i64, tpu.core_type = #tpu.core_type<tc>, window_params = [{transform_indices = @transform_0, window_bounds = array<i64: 8, 24>}, {pipeline_mode = #tpu.pipeline_mode<synchronous>, transform_indices = @transform_1, window_bounds = array<i64: 24, 48>}, {pipeline_mode = #tpu.pipeline_mode<synchronous>, transform_indices = @transform_2, window_bounds = array<i64: 1, 48>}, {pipeline_mode = #tpu.pipeline_mode<synchronous>, transform_indices = @transform_3, window_bounds = array<i64: 48, 24>}, {pipeline_mode = #tpu.pipeline_mode<synchronous>, transform_indices = @transform_4, window_bounds = array<i64: 1, 24>}, {pipeline_mode = #tpu.pipeline_mode<synchronous>, transform_indices = @transform_5, window_bounds = array<i64: 48, 48>}, {transform_indices = @transform_6, window_bounds = array<i64: 8, 24>}]} {
    %c0 = arith.constant 0 : index
    %c0_0 = arith.constant 0 : index
    %0 = vector.load %arg1[%c0, %c0_0] : memref<8x24xf32, #tpu.memory_space<vmem>>, vector<8x24xf32>
    %c0_1 = arith.constant 0 : index
    %c0_2 = arith.constant 0 : index
    %1 = vector.load %arg2[%c0_1, %c0_2] : memref<24x48xf32, #tpu.memory_space<vmem>>, vector<24x48xf32>
    %cst = arith.constant dense<0.000000e+00> : vector<8x48xf32>
    %2 = tpu.matmul %0, %1, %cst {dimension_numbers = #tpu.dot_dimension_numbers<[1], [0], [0], [1], [0, 0, 1, 1], [], []>} : vector<8x24xf32>, vector<24x48xf32>, vector<8x48xf32> -> vector<8x48xf32>
    %c0_3 = arith.constant 0 : index
    %c0_4 = arith.constant 0 : index
    %3 = vector.load %arg3[%c0_3, %c0_4] : memref<1x48xf32, #tpu.memory_space<vmem>>, vector<1x48xf32>
    %4 = vector.broadcast %3 : vector<1x48xf32> to vector<8x48xf32>
    %5 = arith.addf %2, %4 : vector<8x48xf32>
    %6 = arith.mulf %5, %5 : vector<8x48xf32>
    %c0_5 = arith.constant 0 : index
    %c0_6 = arith.constant 0 : index
    %7 = vector.load %arg6[%c0_5, %c0_6] : memref<48x48xf32, #tpu.memory_space<vmem>>, vector<48x48xf32>
    %cst_7 = arith.constant dense<0.000000e+00> : vector<8x48xf32>
    %8 = tpu.matmul %6, %7, %cst_7 {dimension_numbers = #tpu.dot_dimension_numbers<[1], [0], [0], [1], [0, 0, 1, 1], [], []>} : vector<8x48xf32>, vector<48x48xf32>, vector<8x48xf32> -> vector<8x48xf32>
    %cst_8 = arith.constant 9.99999993E-9 : f32
    %9 = vector.broadcast %cst_8 : f32 to vector<8x48xf32>
    %10 = arith.maximumf %8, %9 : vector<8x48xf32>
    %11 = math.sqrt %10 : vector<8x48xf32>
    %cst_9 = arith.constant 0.000000e+00 : f32
    %12 = vector.broadcast %cst_9 : f32 to vector<8x48xf32>
    %13 = arith.subf %12, %11 : vector<8x48xf32>
    %14 = math.exp %13 : vector<8x48xf32>
    %cst_10 = arith.constant 1.000000e+00 : f32
    %15 = vector.broadcast %cst_10 : f32 to vector<8x48xf32>
    %16 = arith.addf %15, %14 : vector<8x48xf32>
    %17 = tpu.reciprocal %16 {approx = true} : vector<8x48xf32> -> vector<8x48xf32>
    %18 = arith.mulf %5, %17 : vector<8x48xf32>
    %c0_11 = arith.constant 0 : index
    %c0_12 = arith.constant 0 : index
    %19 = vector.load %arg4[%c0_11, %c0_12] : memref<48x24xf32, #tpu.memory_space<vmem>>, vector<48x24xf32>
    %cst_13 = arith.constant dense<0.000000e+00> : vector<8x24xf32>
    %20 = tpu.matmul %18, %19, %cst_13 {dimension_numbers = #tpu.dot_dimension_numbers<[1], [0], [0], [1], [0, 0, 1, 1], [], []>} : vector<8x48xf32>, vector<48x24xf32>, vector<8x24xf32> -> vector<8x24xf32>
    %c0_14 = arith.constant 0 : index
    %c0_15 = arith.constant 0 : index
    %21 = vector.load %arg5[%c0_14, %c0_15] : memref<1x24xf32, #tpu.memory_space<vmem>>, vector<1x24xf32>
    %22 = vector.broadcast %21 : vector<1x24xf32> to vector<8x24xf32>
    %23 = arith.addf %20, %22 : vector<8x24xf32>
    %c0_16 = arith.constant 0 : index
    %c0_17 = arith.constant 0 : index
    %24 = vector.load %arg1[%c0_16, %c0_17] : memref<8x24xf32, #tpu.memory_space<vmem>>, vector<8x24xf32>
    %25 = arith.addf %23, %24 : vector<8x24xf32>
    %c0_18 = arith.constant 0 : index
    %c0_19 = arith.constant 0 : index
    %26 = vector.load %arg7[%c0_18, %c0_19] : memref<8x24xf32, #tpu.memory_space<vmem>>, vector<8x24xf32>
    tpu.vector_store %arg7[%c0_18, %c0_19], %25 {strides = array<i32>} : memref<8x24xf32, #tpu.memory_space<vmem>>, vector<8x24xf32>,
    return
  }
  func.func @transform_0(%arg0: i32) -> (i32, i32) {
    %c0_i32 = arith.constant 0 : i32
    %c0_i32_0 = arith.constant 0 : i32
    return %arg0, %c0_i32 : i32, i32
  }
  func.func @transform_1(%arg0: i32) -> (i32, i32) {
    %c0_i32 = arith.constant 0 : i32
    %c0_i32_0 = arith.constant 0 : i32
    %c0_i32_1 = arith.constant 0 : i32
    return %c0_i32, %c0_i32_0 : i32, i32
  }
  func.func @transform_2(%arg0: i32) -> (i32, i32) {
    %c0_i32 = arith.constant 0 : i32
    %c0_i32_0 = arith.constant 0 : i32
    %c0_i32_1 = arith.constant 0 : i32
    return %c0_i32, %c0_i32_0 : i32, i32
  }
  func.func @transform_3(%arg0: i32) -> (i32, i32) {
    %c0_i32 = arith.constant 0 : i32
    %c0_i32_0 = arith.constant 0 : i32
    %c0_i32_1 = arith.constant 0 : i32
    return %c0_i32, %c0_i32_0 : i32, i32
  }
  func.func @transform_4(%arg0: i32) -> (i32, i32) {
    %c0_i32 = arith.constant 0 : i32
    %c0_i32_0 = arith.constant 0 : i32
    %c0_i32_1 = arith.constant 0 : i32
    return %c0_i32, %c0_i32_0 : i32, i32
  }
  func.func @transform_5(%arg0: i32) -> (i32, i32) {
    %c0_i32 = arith.constant 0 : i32
    %c0_i32_0 = arith.constant 0 : i32
    %c0_i32_1 = arith.constant 0 : i32
    return %c0_i32, %c0_i32_0 : i32, i32
  }
  func.func @transform_6(%arg0: i32) -> (i32, i32) {
    %c0_i32 = arith.constant 0 : i32
    %c0_i32_0 = arith.constant 0 : i32
    return %arg0, %c0_i32 : i32, i32
  }
}

</mosaic_0001>

<bundles_post_ra>
// kernel: _geovec_mlp_gvp_forward_impl.1
= control target key start
LH: loop header
LB: loop body
LE: loop exit
PB: predicated region body
PF: predicated region fallthrough
CT: control target
= control target key end

     0   :  { %s488_s21 = smov 0   ;;  %s567_s0 = inlined_call_operand.vmem [shape: f32[16,24], index: 0, kind: input, shape index: {}]   ;;  %s568_s1 = inlined_call_operand.vmem [shape: f32[24,48], index: 1, kind: input, shape index: {}]   ;;  %s569_s2 = inlined_call_operand.vmem [shape: f32[1,48], index: 2, kind: input, shape index: {}]   ;;  %s570_s3 = inlined_call_operand.vmem [shape: f32[48,24], index: 3, kind: input, shape index: {}]   ;;  %s571_s4 = inlined_call_operand.vmem [shape: f32[1,24], index: 4, kind: input, shape index: {}]   ;;  %s572_s5 = inlined_call_operand.vmem [shape: f32[48,48], index: 5, kind: input, shape index: {}]   ;;  %s573_s6 = inlined_call_operand.vmem [shape: f32[16,24], index: 6, kind: output, shape index: {}]  }
   0x1 LB: > { %s417_s22 = sadd.s32 4294967295, %s451_s21   ;;  %p421_p0 = scmp.ge.s32.totalorder %s451_s21, 1  ;;  %s451_s21 = sphi %s488_s21, %s16_s21  }
   0x2   : > { %p211_p1 = scmp.lt.s32.totalorder %s451_s21, 3 }
   0x4   : > { %p212_p2 = pnand %p421_p0, %p211_p1 }
   0x5   : > { %p239_p3 = scmp.lt.s32.totalorder (!%p212_p2), %s417_s22, 1 }
   0x6   : > { %215 = sbr.rel (%p212_p2) target bundleno = 455 (0x1c7), region = 44 }
   0xb   : > { %v250_v0 = vld [vmem:[%s568_s1 + $0x10] sm:$0xff]  ;;  %v249_v1 = vld [vmem:[%s568_s1 + $0x8] sm:$0xff]  ;;  %v284_v3 = vld [vmem:[%s572_s5 + $0x20] sm:$0xff]  ;;  %s575_s22 = smov (!%p239_p3, %s417_s22), 1  ;;  %vm255_vm0 = vcmask 195584   ;;  %vm286_vm1 = vcmask 392192  }
   0xc   : > { %272 = vmatpush.msra.mxu0 %v250_v0  ;;  %v285_v2 = vld [vmem:[%s572_s5 + $0x28] sm:$0xff]  ;;  %v248_v4 = vld [vmem:[%s568_s1] sm:$0xff]  ;;  %v283_v5 = vld [vmem:[%s572_s5 + $0x18] sm:$0xff]  ;;  %s422_s11 = sshll.u32 %s575_s22, 3 }
   0xd   : > { %300 = vmatpush.msra.mxu1 %v285_v2  ;;  %s242_s14 = scalar_lea.vmem %s567_s0, %s422_s11  ;;  %v282_v7 = vld [vmem:[%s572_s5 + $0x10] sm:$0xff]  ;;  %v281_v8 = vld [vmem:[%s572_s5 + $0x8] sm:$0xff]  ;;  %v280_v9 = vld [vmem:[%s572_s5] sm:$0xff]  ;;  %s246_s18 = scalar_lea.vmem %s573_s6, %s422_s11 }
   0xe   : > { %273 = vmatpush.msra.mxu0 %v249_v1  ;;  %v247_v6 = vld [vmem:[%s242_s14] sm:$0xff]  ;;  %v334_v14 = vld [vmem:[%s570_s3 + $0x28] sm:$0xff]  ;;  %v332_v16 = vld [vmem:[%s570_s3 + $0x18] sm:$0xff] }
   0xf   : > { %301 = vmatpush.msra.mxu1 %v284_v3  ;;  %v437_v10 = vld [vmem:[%s569_s2] ss:$0 sm:$0xff]  ;;  %352 = vmatpush.msra.mxu2 %v334_v14  ;;  %v331_v17 = vld [vmem:[%s570_s3 + $0x10] sm:$0xff]  ;;  %v330_v18 = vld [vmem:[%s570_s3 + $0x8] sm:$0xff] }
  0x10   : > { %274 = vmatpush.msra.mxu0 %v248_v4  ;;  %v333_v15 = vld [vmem:[%s570_s3 + $0x20] sm:$0xff] }
  0x11   : > { %302 = vmatpush.msra.mxu1 %v283_v5  ;;  %424 = vmatmul.msk.f32.vlgmr.msra.gmra.mxu0 %vm255_vm0, %v247_v6  ;;  %v329_v19 = vld [vmem:[%s570_s3] sm:$0xff] }
  0x12   : > { %353 = vmatpush.msra.mxu2 %v333_v15  ;;  %v438_v38 = vld [vmem:[%s571_s4] ss:$0 sm:$0xff] }
  0x13   : > { %303 = vmatpush.msra.mxu1 %v282_v7 }
  0x14   : > { %354 = vmatpush.msra.mxu2 %v332_v16 }
  0x15   : > { %304 = vmatpush.msra.mxu1 %v281_v8 }
  0x16   : > { %355 = vmatpush.msra.mxu2 %v331_v17 }
  0x17   : > { %305 = vmatpush.msra.mxu1 %v280_v9 }
  0x18   : > { %356 = vmatpush.msra.mxu2 %v330_v18 }
  0x1a   : > { %357 = vmatpush.msra.mxu2 %v329_v19 }
  0x8e   : > { %v276_v11 = vpop.f32.mrf.mxu0 }
  0x8f   : > { %v277_v12 = vadd.f32 %v437_v10, %v276_v11 }
  0x91   : > { %v279_v13 = vmul.f32 %v277_v12, %v277_v12 }
  0x93   : > { %425 = vmatmul.msk.f32.vlgmr.msra.gmra.mxu1 %vm286_vm1, %v279_v13 }
 0x110   : > { %v307_v20 = vpop.f32.mrf.mxu1 }
 0x111   : > { %v310_v21 = vmax.f32 %v307_v20, 1e-08 }
 0x113   : > { %439 = vrsqrt.f32 %v310_v21  ;;  %vm318_vm2 = vcmp.eq.f32.partialorder %v310_v21, inf  ;;  %v321_v29 = vand.u32 2147483648, %v310_v21  ;;  %vm320_vm3 = vcmp.eq.f32.partialorder %v310_v21, 0.0 }
 0x119   : > { %v440_v22 = vpop.eup %439 }
 0x11a   : > { %v312_v23 = vmul.f32 %v440_v22, %v310_v21 }
 0x11c   : > { %v313_v24 = vmul.f32 %v440_v22, %v312_v23 }
 0x11e   : > { %v314_v25 = vmul.f32 0.5, %v313_v24 }
 0x120   : > { %v315_v26 = vsub.f32 1.5, %v314_v25 }
 0x122   : > { %v316_v27 = vmul.f32 %v440_v22, %v315_v26 }
 0x124   : > { %v317_v28 = vmul.f32 %v316_v27, %v310_v21 }
 0x126   : > { %v319_v30 = vsel %vm318_vm2, %v310_v21, %v317_v28 }
 0x127   : > { %v322_v31 = vsel %vm320_vm3, %v321_v29, %v319_v30 }
 0x128   : > { %v323_v32 = vsub.f32 0.0, %v322_v31 }
 0x12a   : > { %v324_v33 = vmul.f32 1.442695, %v323_v32 }
 0x12c   : > { %441 = vpow2.f32 %v324_v33 }
 0x132   : > { %v442_v34 = vpop.eup %441 }
 0x133   : > { %v326_v35 = vadd.f32 1.0, %v442_v34 }
 0x135   : > { %443 = vrcp.f32 %v326_v35 }
 0x13b   : > { %v444_v36 = vpop.eup %443 }
 0x13c   : > { %v328_v37 = vmul.f32 %v444_v36, %v277_v12 }
 0x13e   : > { %426 = vmatmul.msk.f32.vlgmr.msra.gmra.mxu2 %vm286_vm1, %v328_v37 }
 0x1c1   : > { %v359_v39 = vpop.f32.mrf.mxu2 }
 0x1c2   : > { %v360_v40 = vadd.f32 %v438_v38, %v359_v39 }
 0x1c4   : > { %v362_v41 = vadd.f32 %v360_v40, %v247_v6 }
 0x1c6   : > { %363 = vst.msk [vmem:[%s246_s18] sm:$0xff] %vm255_vm0, %v362_v41 }
 0x1c7 PF: > { %s16_s21 = sadd.s32 1, %s451_s21  }
 0x1c8   : > { %p13_p4 = scmp.ge.s32.totalorder %s16_s21, 4  }
 0x1ca   :  { %15 = sbr.rel (!%p13_p4) target bundleno = 1 (0x1), region = 74 }

</bundles_post_ra>
